<compile_context>
chip_gen: v7x
topology: tpu7x:2x2x1
jax: 0.10.0
libtpu: 0.0.40
codegen_flags: <defaults>
</compile_context>

<pallas_src>
import jax
import jax.numpy as jnp
from jax.experimental import pallas as pl
from jax.experimental.pallas import tpu as pltpu


def _fused_attn_kernel(x_ref, wq_ref, wk_ref, wv_ref, wp_ref, b_ref,
                       o_ref, acc_ref):
    # x_ref : (Bb, N, C)   input block, resident across the head axis
    # wq/wk/wv_ref : (1, C, hd)   this head's qkv weight columns (scale in wq)
    # wp_ref: (1, hd, C)   this head's rows of the output projection
    # b_ref : (1, C)       proj bias
    # o_ref : (Bb, N, C)   output block (resident; written at the last head)
    # acc_ref: (Bb, N, C)  f32 accumulator over heads
    h = pl.program_id(1)

    @pl.when(h == 0)
    def _init():
        acc_ref[...] = jnp.zeros_like(acc_ref)

    x = x_ref[...]                                          # (Bb, N, C)
    Bb = x.shape[0]
    dt = x.dtype

    # Broadcast per-head weights over the batch-block dim so every matmul is a
    # batched 3-D einsum (no in-kernel flattening, no rank-3 x rank-2 dots).
    wq = jnp.broadcast_to(wq_ref[0], (Bb,) + wq_ref.shape[1:])   # (Bb, C, hd)
    wk = jnp.broadcast_to(wk_ref[0], (Bb,) + wk_ref.shape[1:])
    wv = jnp.broadcast_to(wv_ref[0], (Bb,) + wv_ref.shape[1:])
    wp = jnp.broadcast_to(wp_ref[0], (Bb,) + wp_ref.shape[1:])   # (Bb, hd, C)

    # Per-head Q/K/V projection straight from the resident x block
    # (contraction depth = C, i.e. full MXU systolic depth).
    q = jnp.einsum("bnc,bcd->bnd", x, wq,
                   preferred_element_type=jnp.float32).astype(dt)
    k = jnp.einsum("bnc,bcd->bnd", x, wk,
                   preferred_element_type=jnp.float32).astype(dt)
    v = jnp.einsum("bnc,bcd->bnd", x, wv,
                   preferred_element_type=jnp.float32).astype(dt)

    # Scores + numerically-stable softmax (f32); normalization deferred past
    # the P@V matmul (one (Bb,N,hd) multiply instead of an (Bb,N,N) one).
    s = jnp.einsum("bnd,bmd->bnm", q, k,
                   preferred_element_type=jnp.float32)           # (Bb, N, N)
    s = s - jnp.max(s, axis=-1, keepdims=True)
    p = jnp.exp(s)
    denom = jnp.sum(p, axis=-1, keepdims=True)                   # (Bb, N, 1)

    ctx = jnp.einsum("bnm,bmd->bnd", p.astype(dt), v,
                     preferred_element_type=jnp.float32)         # (Bb, N, hd)
    ctx = ctx * pl.reciprocal(denom, approx=True)

    # Accumulate this head's slice of the output projection.
    acc_ref[...] += jnp.einsum("bnd,bdc->bnc", ctx.astype(dt), wp,
                               preferred_element_type=jnp.float32)

    @pl.when(h == pl.num_programs(1) - 1)
    def _finalize():
        out = acc_ref[...] + b_ref[...].astype(jnp.float32)
        o_ref[...] = out.astype(o_ref.dtype)


def _vmem_limit_bytes():
    """~75% of physical VMEM, capped at 96 MiB.
    v5e/v6e (128 MiB phys) -> 96 MiB; v7x (64 MiB phys) -> 48 MiB."""
    try:
        cap = pltpu.get_tpu_info().vmem_capacity_bytes
        return int(min(96 * 1024 * 1024, (cap * 3) // 4))
    except Exception:
        return 64 * 1024 * 1024


def _pick_batch_block(B, N, C, hd, itemsize, budget):
    """Pick Bb (a divisor of B) such that:
       (a) the parallel grid axis keeps >= 2 steps when B >= 2 (megacore / v7x),
       (b) the per-step VMEM estimate fits the budget,
       preferring the smallest block that reaches ~512 GEMM rows."""
    def est(bb):
        rows = bb * N
        io = 4 * rows * C * itemsize              # x + out blocks, double-buffered
        acc = rows * C * 4                        # f32 accumulator scratch
        qkv = 4 * rows * hd * 4                   # q, k, v, ctx temporaries (f32)
        sco = 2 * rows * N * 4                    # scores / exp(scores) (f32)
        wts = 2 * 4 * C * hd * itemsize           # per-head weights, double-buffered
        bcast = 4 * bb * C * hd * itemsize        # weights broadcast over batch block
        return io + acc + qkv + sco + wts + bcast

    divisors = [d for d in range(1, B + 1) if B % d == 0]
    if B >= 2:
        divisors = [d for d in divisors if B // d >= 2] or [1]
    fitting = [d for d in divisors if est(d) <= budget] or [min(divisors)]
    for d in sorted(fitting):
        if d * N >= 512:
            return d
    return max(fitting)


def attention_forward(x, wqkv_t, wproj_t, bproj, *, num_heads):
    """x: (B, N, C); wqkv_t: (C, 3C); wproj_t: (C, C); bproj: (C,).
    Weight layout matches `x @ W` (i.e. the transpose of nn.Linear's storage)."""
    B, N, C = x.shape
    assert C % num_heads == 0
    hd = C // num_heads
    scale = hd ** (-0.5)
    dt = x.dtype
    itemsize = jnp.dtype(dt).itemsize

    # Host-side, weight-only relayouts (tiny; done once per call / fused by jit).
    # qkv columns are [q | k | v], each head-major (channel = h * hd + d).
    # The attention scale is folded into the Q columns (qkv_bias=False).
    wq = jnp.transpose((wqkv_t[:, :C] * scale).reshape(C, num_heads, hd),
                       (1, 0, 2)).astype(dt)                     # (H, C, hd)
    wk = jnp.transpose(wqkv_t[:, C:2 * C].reshape(C, num_heads, hd),
                       (1, 0, 2)).astype(dt)
    wv = jnp.transpose(wqkv_t[:, 2 * C:].reshape(C, num_heads, hd),
                       (1, 0, 2)).astype(dt)
    wp = wproj_t.reshape(num_heads, hd, C).astype(dt)            # (H, hd, C)
    b2 = bproj.reshape(1, C)

    vmem_limit = _vmem_limit_bytes()
    Bb = _pick_batch_block(B, N, C, hd, itemsize, budget=(vmem_limit * 3) // 5)
    nb = B // Bb

    out = pl.pallas_call(
        _fused_attn_kernel,
        out_shape=jax.ShapeDtypeStruct((B, N, C), dt),
        grid_spec=pltpu.PrefetchScalarGridSpec(
            num_scalar_prefetch=0,
            grid=(nb, num_heads),
            in_specs=[
                pl.BlockSpec((Bb, N, C), lambda bb, h: (bb, 0, 0)),   # x
                pl.BlockSpec((1, C, hd), lambda bb, h: (h, 0, 0)),    # wq (scaled)
                pl.BlockSpec((1, C, hd), lambda bb, h: (h, 0, 0)),    # wk
                pl.BlockSpec((1, C, hd), lambda bb, h: (h, 0, 0)),    # wv
                pl.BlockSpec((1, hd, C), lambda bb, h: (h, 0, 0)),    # wproj rows
                pl.BlockSpec((1, C), lambda bb, h: (0, 0)),           # bias
            ],
            out_specs=pl.BlockSpec((Bb, N, C), lambda bb, h: (bb, 0, 0)),
            scratch_shapes=[pltpu.VMEM((Bb, N, C), jnp.float32)],
        ),
        compiler_params=pltpu.CompilerParams(
            dimension_semantics=("parallel", "arbitrary"),
            vmem_limit_bytes=vmem_limit,
        ),
    )(x, wq, wk, wv, wp, b2)
    return out


def attention_reference(x, wqkv_t, wproj_t, bproj, *, num_heads):
    """Pure-JAX reference matching the PyTorch module semantics."""
    B, N, C = x.shape
    hd = C // num_heads
    scale = hd ** (-0.5)
    qkv = jnp.einsum("bnc,cd->bnd", x, wqkv_t)                   # (B, N, 3C)
    qkv = qkv.reshape(B, N, 3, num_heads, hd)
    q, k, v = jnp.transpose(qkv, (2, 0, 3, 1, 4))                # (B, H, N, hd)
    attn = jnp.einsum("bhnd,bhmd->bhnm", q, k) * scale
    attn = jax.nn.softmax(attn, axis=-1)
    out = jnp.einsum("bhnm,bhmd->bhnd", attn, v)                 # (B, H, N, hd)
    out = jnp.transpose(out, (0, 2, 1, 3)).reshape(B, N, C)
    return jnp.einsum("bnc,cd->bnd", out, wproj_t) + bproj


if __name__ == "__main__":
    # Small shapes consistent with the module: B=2, N=8 tokens, C=32 channels,
    # num_heads=8 -> head_dim=4.
    B, N, C = 2, 8, 32
    num_heads = 8

    key = jax.random.PRNGKey(0)
    k_x, k_wqkv, k_wproj, k_bproj = jax.random.split(key, 4)

    x = jax.random.normal(k_x, (B, N, C), dtype=jnp.float32)
    # nn.Linear stores (out, in); we pass the transposed "x @ W" form directly.
    wqkv_t = 0.05 * jax.random.normal(k_wqkv, (C, 3 * C), dtype=jnp.float32)
    wproj_t = 0.05 * jax.random.normal(k_wproj, (C, C), dtype=jnp.float32)
    bproj = 0.01 * jax.random.normal(k_bproj, (C,), dtype=jnp.float32)

    out = attention_forward(x, wqkv_t, wproj_t, bproj, num_heads=num_heads)
    out = jax.block_until_ready(out)

    ref = attention_reference(x, wqkv_t, wproj_t, bproj, num_heads=num_heads)
    assert out.shape == (B, N, C)
    # approx softmax reciprocal (EUP vrcp) introduces ~1e-3-level relative error
    assert jnp.allclose(out, ref, atol=2e-3, rtol=2e-3), "mismatch vs. reference"

    print("KERNEL_OK")
</pallas_src>

<mosaic_0001>
module attributes {stable_mosaic.version = 11 : i64} {
  func.func @_fused_attn_kernel(%arg0: i32, %arg1: i32, %arg2: memref<1x8x32xf32, #tpu.memory_space<vmem>>, %arg3: memref<1x32x4xf32, #tpu.memory_space<vmem>>, %arg4: memref<1x32x4xf32, #tpu.memory_space<vmem>>, %arg5: memref<1x32x4xf32, #tpu.memory_space<vmem>>, %arg6: memref<1x4x32xf32, #tpu.memory_space<vmem>>, %arg7: memref<1x32xf32, #tpu.memory_space<vmem>>, %arg8: memref<1x8x32xf32, #tpu.memory_space<vmem>>, %arg9: memref<1x8x32xf32, #tpu.memory_space<vmem>>) attributes {dimension_semantics = [#tpu.dimension_semantics<parallel>, #tpu.dimension_semantics<arbitrary>], iteration_bounds = array<i64: 2, 8>, scalar_prefetch = 0 : i64, scratch_operands = 1 : i64, tpu.core_type = #tpu.core_type<tc>, window_params = [{transform_indices = @transform_0, window_bounds = array<i64: 1, 8, 32>}, {transform_indices = @transform_1, window_bounds = array<i64: 1, 32, 4>}, {transform_indices = @transform_2, window_bounds = array<i64: 1, 32, 4>}, {transform_indices = @transform_3, window_bounds = array<i64: 1, 32, 4>}, {transform_indices = @transform_4, window_bounds = array<i64: 1, 4, 32>}, {pipeline_mode = #tpu.pipeline_mode<synchronous>, transform_indices = @transform_5, window_bounds = array<i64: 1, 32>}, {transform_indices = @transform_6, window_bounds = array<i64: 1, 8, 32>}]} {
    %c0_i32 = arith.constant 0 : i32
    %0 = arith.cmpi eq, %arg1, %c0_i32 : i32
    %1 = arith.extui %0 : i1 to i32
    %c0_i32_0 = arith.constant 0 : i32
    %2 = arith.cmpi ne, %1, %c0_i32_0 : i32
    scf.if %2 {
      %cst_29 = arith.constant 0.000000e+00 : f32
      %38 = vector.broadcast %cst_29 : f32 to vector<1x8x32xf32>
      %c0_30 = arith.constant 0 : index
      %c0_31 = arith.constant 0 : index
      %c0_32 = arith.constant 0 : index
      %39 = vector.load %arg9[%c0_30, %c0_31, %c0_32] : memref<1x8x32xf32, #tpu.memory_space<vmem>>, vector<1x8x32xf32>
      tpu.vector_store %arg9[%c0_30, %c0_31, %c0_32], %38 {strides = array<i32>} : memref<1x8x32xf32, #tpu.memory_space<vmem>>, vector<1x8x32xf32>,
    } else {
    }
    %c0 = arith.constant 0 : index
    %c0_1 = arith.constant 0 : index
    %c0_2 = arith.constant 0 : index
    %3 = vector.load %arg2[%c0, %c0_1, %c0_2] : memref<1x8x32xf32, #tpu.memory_space<vmem>>, vector<1x8x32xf32>
    %c0_3 = arith.constant 0 : index
    %c0_4 = arith.constant 0 : index
    %c0_5 = arith.constant 0 : index
    %4 = vector.load %arg3[%c0_3, %c0_4, %c0_5] : memref<1x32x4xf32, #tpu.memory_space<vmem>>, vector<1x32x4xf32>
    %5 = vector.shape_cast %4 : vector<1x32x4xf32> to vector<32x4xf32>
    %6 = vector.shape_cast %5 : vector<32x4xf32> to vector<1x32x4xf32>
    %c0_6 = arith.constant 0 : index
    %c0_7 = arith.constant 0 : index
    %c0_8 = arith.constant 0 : index
    %7 = vector.load %arg4[%c0_6, %c0_7, %c0_8] : memref<1x32x4xf32, #tpu.memory_space<vmem>>, vector<1x32x4xf32>
    %8 = vector.shape_cast %7 : vector<1x32x4xf32> to vector<32x4xf32>
    %9 = vector.shape_cast %8 : vector<32x4xf32> to vector<1x32x4xf32>
    %c0_9 = arith.constant 0 : index
    %c0_10 = arith.constant 0 : index
    %c0_11 = arith.constant 0 : index
    %10 = vector.load %arg5[%c0_9, %c0_10, %c0_11] : memref<1x32x4xf32, #tpu.memory_space<vmem>>, vector<1x32x4xf32>
    %11 = vector.shape_cast %10 : vector<1x32x4xf32> to vector<32x4xf32>
    %12 = vector.shape_cast %11 : vector<32x4xf32> to vector<1x32x4xf32>
    %c0_12 = arith.constant 0 : index
    %c0_13 = arith.constant 0 : index
    %c0_14 = arith.constant 0 : index
    %13 = vector.load %arg6[%c0_12, %c0_13, %c0_14] : memref<1x4x32xf32, #tpu.memory_space<vmem>>, vector<1x4x32xf32>
    %14 = vector.shape_cast %13 : vector<1x4x32xf32> to vector<4x32xf32>
    %15 = vector.shape_cast %14 : vector<4x32xf32> to vector<1x4x32xf32>
    "tpu.trace_start"() <{level = 10 : i32, message = "bnc,bcd->bnd"}> : () -> ()
    %cst = arith.constant dense<0.000000e+00> : vector<1x8x4xf32>
    %16 = tpu.matmul %3, %6, %cst {dimension_numbers = #tpu.dot_dimension_numbers<[2], [1], [1], [2], [0, 0, 0, 1, 1, 2], [0], [0]>} : vector<1x8x32xf32>, vector<1x32x4xf32>, vector<1x8x4xf32> -> vector<1x8x4xf32>
    %cst_15 = arith.constant dense<0.000000e+00> : vector<1x8x4xf32>
    %17 = tpu.matmul %3, %9, %cst_15 {dimension_numbers = #tpu.dot_dimension_numbers<[2], [1], [1], [2], [0, 0, 0, 1, 1, 2], [0], [0]>} : vector<1x8x32xf32>, vector<1x32x4xf32>, vector<1x8x4xf32> -> vector<1x8x4xf32>
    %cst_16 = arith.constant dense<0.000000e+00> : vector<1x8x4xf32>
    %18 = tpu.matmul %3, %12, %cst_16 {dimension_numbers = #tpu.dot_dimension_numbers<[2], [1], [1], [2], [0, 0, 0, 1, 1, 2], [0], [0]>} : vector<1x8x32xf32>, vector<1x32x4xf32>, vector<1x8x4xf32> -> vector<1x8x4xf32>
    "tpu.trace_stop"() : () -> ()
    "tpu.trace_start"() <{level = 10 : i32, message = "bnd,bmd->bnm"}> : () -> ()
    %cst_17 = arith.constant dense<0.000000e+00> : vector<1x8x8xf32>
    %19 = tpu.matmul %16, %17, %cst_17 {dimension_numbers = #tpu.dot_dimension_numbers<[2], [2], [1], [1], [0, 0, 0, 1, 1, 1], [0], [0]>} : vector<1x8x4xf32>, vector<1x8x4xf32>, vector<1x8x8xf32> -> vector<1x8x8xf32>
    "tpu.trace_stop"() : () -> ()
    %cst_18 = arith.constant dense<0xFF800000> : vector<1x8xf32>
    %20 = vector.multi_reduction <maximumf>, %19, %cst_18 [2] : vector<1x8x8xf32> to vector<1x8xf32>
    %21 = vector.shape_cast %20 : vector<1x8xf32> to vector<1x8x1xf32>
    %22 = vector.broadcast %21 : vector<1x8x1xf32> to vector<1x8x8xf32>
    %23 = arith.subf %19, %22 : vector<1x8x8xf32>
    %24 = math.exp %23 : vector<1x8x8xf32>
    %cst_19 = arith.constant dense<0.000000e+00> : vector<1x8xf32>
    %25 = vector.multi_reduction <add>, %24, %cst_19 [2] : vector<1x8x8xf32> to vector<1x8xf32>
    %26 = vector.shape_cast %25 : vector<1x8xf32> to vector<1x8x1xf32>
    "tpu.trace_start"() <{level = 10 : i32, message = "bnm,bmd->bnd"}> : () -> ()
    %cst_20 = arith.constant dense<0.000000e+00> : vector<1x8x4xf32>
    %27 = tpu.matmul %24, %18, %cst_20 {dimension_numbers = #tpu.dot_dimension_numbers<[2], [1], [1], [2], [0, 0, 0, 1, 1, 2], [0], [0]>} : vector<1x8x8xf32>, vector<1x8x4xf32>, vector<1x8x4xf32> -> vector<1x8x4xf32>
    "tpu.trace_stop"() : () -> ()
    %28 = tpu.reciprocal %26 {approx = true} : vector<1x8x1xf32> -> vector<1x8x1xf32>
    %29 = vector.broadcast %28 : vector<1x8x1xf32> to vector<1x8x4xf32>
    %30 = arith.mulf %27, %29 : vector<1x8x4xf32>
    %c0_21 = arith.constant 0 : index
    %c0_22 = arith.constant 0 : index
    %c0_23 = arith.constant 0 : index
    %31 = vector.load %arg9[%c0_21, %c0_22, %c0_23] : memref<1x8x32xf32, #tpu.memory_space<vmem>>, vector<1x8x32xf32>
    "tpu.trace_start"() <{level = 10 : i32, message = "bnd,bdc->bnc"}> : () -> ()
    %cst_24 = arith.constant dense<0.000000e+00> : vector<1x8x32xf32>
    %32 = tpu.matmul %30, %15, %cst_24 {dimension_numbers = #tpu.dot_dimension_numbers<[2], [1], [1], [2], [0, 0, 0, 1, 1, 2], [0], [0]>} : vector<1x8x4xf32>, vector<1x4x32xf32>, vector<1x8x32xf32> -> vector<1x8x32xf32>
    "tpu.trace_stop"() : () -> ()
    %33 = arith.addf %31, %32 : vector<1x8x32xf32>
    %c0_25 = arith.constant 0 : index
    %c0_26 = arith.constant 0 : index
    %c0_27 = arith.constant 0 : index
    %34 = vector.load %arg9[%c0_25, %c0_26, %c0_27] : memref<1x8x32xf32, #tpu.memory_space<vmem>>, vector<1x8x32xf32>
    tpu.vector_store %arg9[%c0_25, %c0_26, %c0_27], %33 {strides = array<i32>} : memref<1x8x32xf32, #tpu.memory_space<vmem>>, vector<1x8x32xf32>,
    %c7_i32 = arith.constant 7 : i32
    %35 = arith.cmpi eq, %arg1, %c7_i32 : i32
    %36 = arith.extui %35 : i1 to i32
    %c0_i32_28 = arith.constant 0 : i32
    %37 = arith.cmpi ne, %36, %c0_i32_28 : i32
    scf.if %37 {
      %c0_29 = arith.constant 0 : index
      %c0_30 = arith.constant 0 : index
      %c0_31 = arith.constant 0 : index
      %38 = vector.load %arg9[%c0_29, %c0_30, %c0_31] : memref<1x8x32xf32, #tpu.memory_space<vmem>>, vector<1x8x32xf32>
      %c0_32 = arith.constant 0 : index
      %c0_33 = arith.constant 0 : index
      %39 = vector.load %arg7[%c0_32, %c0_33] : memref<1x32xf32, #tpu.memory_space<vmem>>, vector<1x32xf32>
      %40 = vector.shape_cast %39 : vector<1x32xf32> to vector<1x1x32xf32>
      %41 = vector.broadcast %40 : vector<1x1x32xf32> to vector<1x8x32xf32>
      %42 = arith.addf %38, %41 : vector<1x8x32xf32>
      %c0_34 = arith.constant 0 : index
      %c0_35 = arith.constant 0 : index
      %c0_36 = arith.constant 0 : index
      %43 = vector.load %arg8[%c0_34, %c0_35, %c0_36] : memref<1x8x32xf32, #tpu.memory_space<vmem>>, vector<1x8x32xf32>
      tpu.vector_store %arg8[%c0_34, %c0_35, %c0_36], %42 {strides = array<i32>} : memref<1x8x32xf32, #tpu.memory_space<vmem>>, vector<1x8x32xf32>,
    } else {
    }
    return
  }
  func.func @transform_0(%arg0: i32, %arg1: i32) -> (i32, i32, i32) {
    %c0_i32 = arith.constant 0 : i32
    %c0_i32_0 = arith.constant 0 : i32
    %c0_i32_1 = arith.constant 0 : i32
    return %arg0, %c0_i32, %c0_i32_0 : i32, i32, i32
  }
  func.func @transform_1(%arg0: i32, %arg1: i32) -> (i32, i32, i32) {
    %c0_i32 = arith.constant 0 : i32
    %c0_i32_0 = arith.constant 0 : i32
    %c0_i32_1 = arith.constant 0 : i32
    return %arg1, %c0_i32, %c0_i32_0 : i32, i32, i32
  }
  func.func @transform_2(%arg0: i32, %arg1: i32) -> (i32, i32, i32) {
    %c0_i32 = arith.constant 0 : i32
    %c0_i32_0 = arith.constant 0 : i32
    %c0_i32_1 = arith.constant 0 : i32
    return %arg1, %c0_i32, %c0_i32_0 : i32, i32, i32
  }
  func.func @transform_3(%arg0: i32, %arg1: i32) -> (i32, i32, i32) {
    %c0_i32 = arith.constant 0 : i32
    %c0_i32_0 = arith.constant 0 : i32
    %c0_i32_1 = arith.constant 0 : i32
    return %arg1, %c0_i32, %c0_i32_0 : i32, i32, i32
  }
  func.func @transform_4(%arg0: i32, %arg1: i32) -> (i32, i32, i32) {
    %c0_i32 = arith.constant 0 : i32
    %c0_i32_0 = arith.constant 0 : i32
    %c0_i32_1 = arith.constant 0 : i32
    return %arg1, %c0_i32, %c0_i32_0 : i32, i32, i32
  }
  func.func @transform_5(%arg0: i32, %arg1: i32) -> (i32, i32) {
    %c0_i32 = arith.constant 0 : i32
    %c0_i32_0 = arith.constant 0 : i32
    %c0_i32_1 = arith.constant 0 : i32
    return %c0_i32, %c0_i32_0 : i32, i32
  }
  func.func @transform_6(%arg0: i32, %arg1: i32) -> (i32, i32, i32) {
    %c0_i32 = arith.constant 0 : i32
    %c0_i32_0 = arith.constant 0 : i32
    %c0_i32_1 = arith.constant 0 : i32
    return %arg0, %c0_i32, %c0_i32_0 : i32, i32, i32
  }
}

</mosaic_0001>

<bundles_post_ra>
// kernel: tpu_custom_call.1
= control target key start
LH: loop header
LB: loop body
LE: loop exit
PB: predicated region body
PF: predicated region fallthrough
CT: control target
= control target key end

     0   :  { %s2243_s0 = inlined_call_operand.hbm [shape: f32[2,8,32], index: 0, kind: input, shape index: {}]   ;;  %s2244_s1 = inlined_call_operand.hbm [shape: f32[8,32,4], index: 1, kind: input, shape index: {}]   ;;  %s2245_s2 = inlined_call_operand.hbm [shape: f32[8,32,4], index: 2, kind: input, shape index: {}]   ;;  %s2246_s3 = inlined_call_operand.hbm [shape: f32[8,32,4], index: 3, kind: input, shape index: {}]   ;;  %s2247_s4 = inlined_call_operand.hbm [shape: f32[8,4,32], index: 4, kind: input, shape index: {}]   ;;  %s2248_s5 = inlined_call_operand.hbm [shape: f32[1,32], index: 5, kind: input, shape index: {}]   ;;  %s2249_s6 = inlined_call_operand.hbm [shape: f32[2,8,32], index: 6, kind: output, shape index: {}]  }
   0x1   :  { %2280 = sst [smem:[#allocation33_spill]] %s2244_s1 }
   0x2   :  { %2281 = sst [smem:[#allocation34_spill]] %s2246_s3 }
   0x3   :  { %2282 = sst [smem:[#allocation35_spill]] %s2248_s5 }
   0x4   :  { %2283 = sst [smem:[#allocation36_spill]] %s2249_s6 }
   0x5   :  { %11 = vsyncpa [#allocation4], 0 }
   0x6   :  { %13 = vsyncpa [#allocation4 + $0x1], 0 }
   0x7   :  { %14 = vsyncpa [#allocation7], 0 }
   0x8   :  { %16 = vsyncpa [#allocation7 + $0x1], 0 }
   0x9   :  { %17 = vsyncpa [#allocation10], 0 }
   0xa   :  { %19 = vsyncpa [#allocation10 + $0x1], 0 }
   0xb   :  { %20 = vsyncpa [#allocation13], 0 }
   0xc   :  { %21 = vsyncpa [#allocation5], 0 }
   0xd   :  { %23 = vsyncpa [#allocation5 + $0x1], 0  ;;  %s1760_s21 = smov 0   ;;  %s1762_s22 = smov 0  }
   0xe   :  { %s1764_s23 = smov 0   ;;  %s1766_s24 = smov 0  }
   0xf   :  { %s1768_s25 = smov 0   ;;  %s1770_s26 = smov 0  }
  0x10   :  { %s1772_s27 = smov 0   ;;  %s1774_s28 = smov 0  }
  0x11   :  { %s1776_s29 = smov 0   ;;  %s1778_s30 = smov 0  }
  0x12   :  { %s1780_s7 = smov 0  }
  0x13 LB: > { %2284 = sst [smem:[#allocation20_spill]] %s1674_s22  ;;  %p2254_p0 = scmp.eq.s32.totalorder %s1710_s7, 0  ;;  %s1710_s7 = sphi %s1780_s7, %s29_s7   ;;  %s1706_s30 = sphi %s1778_s30, %s2345_s30   ;;  %s1702_s29 = sphi %s1776_s29, %s2352_s29   ;;  %s1698_s28 = sphi %s1774_s28, %s2343_s28   ;;  %s1694_s27 = sphi %s1772_s27, %s2351_s27   ;;  %s1690_s26 = sphi %s1770_s26, %s2350_s26   ;;  %s1686_s25 = sphi %s1768_s25, %s2349_s25   ;;  %s1682_s24 = sphi %s1766_s24, %s2348_s24   ;;  %s1678_s23 = sphi %s1764_s23, %s2347_s23   ;;  %s1674_s22 = sphi %s1762_s22, %s2346_s22   ;;  %s1670_s21 = sphi %s1760_s21, %s2341_s21  }
  0x14   : > { %2285 = sst [smem:[#allocation21_spill]] %s1682_s24  ;;  %p81_p1 = scmp.ne.s32.totalorder %s1678_s23, %s1674_s22 }
  0x15   : > { %2286 = sst [smem:[#allocation22_spill]] %s1694_s27  ;;  %p2253_p2 = scmp.lt.s32.totalorder %s1710_s7, 16 }
  0x16   : > { %2287 = sst [smem:[#allocation23_spill]] %s1698_s28  ;;  %s2252_s9 = sand.u32 1, %s1710_s7  }
  0x17   : > { %2288 = sst [smem:[#allocation24_spill]] %s1706_s30  ;;  %p83_p3 = por %p81_p1, %p2254_p0 }
  0x18   : > { %s2250_s10 = sand.u32 1, %s1678_s23   ;;  %s1825_s11 = sshll.u32 %s1702_s29, 9 }
  0x19   : > { %s1829_s12 = sshll.u32 %s2250_s10, 5  ;;  %s2289_s1 = sld [smem:[#allocation33_spill]] }
  0x1a   : > { %p1839_p4 = pnand %p2253_p2, %p83_p3  ;;  %s269_s17 = scalar_lea.vmem [#allocation6], %s1829_s12 }
  0x1b   : > { %s276_s18 = sshll.u32 %s269_s17, 4  ;;  %s1848_s19 = scalar_lea.sflag [#allocation7], %s2252_s9  ;;  %s1844_s18 = int_to_ptr.vmem [resolvable:$true] %s276_s18 }
  0x1c   : > { %s2290_s16 = scalar_select %p1839_p4, 1, 0 }
  0x1d   : > { %p1854_p6 = pneg %p1839_p4 }
  0x1f   : > { %s1835_s15 = scalar_lea.hbm %s2289_s1, %s1825_s11  ;;  %s1403_s17 = scalar_lea.hbm %s2289_s1, 4096 }
  0x20   : > { %s1398_s20 = scalar_lea.hbm %s1835_s15, 512  ;;  %p1404_p9 = scmp.lt.u32.totalorder %s1835_s15, %s2289_s1 }
  0x21   : > { %p1399_p5 = scmp.ne.s32.totalorder %s1835_s15, %s1398_s20  ;;  %p1405_p10 = scmp.lt.u32.totalorder %s1403_s17, %s1398_s20 }
  0x22   : > { %s2291_s13 = scalar_select %p1854_p6, 1, 0 }
  0x23   : > { %p1401_p7 = pnand %p1854_p6, %p1399_p5  ;;  %p1406_p11 = por %p1405_p10, %p1404_p9 }
  0x24   : > { %p1407_p12 = scmp.lt.u32.totalorder %s1398_s20, %s1835_s15 }
  0x25   : > { %p1402_p8 = pneg %p1401_p7 }
  0x26   : > { %p1408_p13 = por %p1407_p12, %p1406_p11 }
  0x28   : > { %p1409_p1 = pnand %p1408_p13, %p1402_p8 }
  0x2a   : > { %1412 = shalt.err (!%p1409_p1)
}
  0x2b   : > { %s1413_s9 = scalar_lea.vmem %s1844_s18, 512  ;;  %s1712_s10 = smov [#allocation6]  }
  0x2c   : > { %p1414_p3 = scmp.ne.s32.totalorder %s1844_s18, %s1413_s9  ;;  %s1418_s14 = sshll.u32 %s1712_s10, 4  ;;  %s1419_s14 = int_to_ptr.vmem [resolvable:$false] %s1418_s14 }
  0x2d   : > { %s1420_s6 = scalar_lea.vmem %s1419_s14, 1024  ;;  %p1421_p2 = scmp.lt.s32.totalorder %s1844_s18, %s1419_s14 }
  0x2e   : > { %p1416_p5 = pnand %p1414_p3, %p1854_p6  ;;  %p1422_p0 = scmp.lt.s32.totalorder %s1420_s6, %s1413_s9 }
  0x30   : > { %p1417_p7 = pneg %p1416_p5  ;;  %p1423_p9 = por %p1422_p0, %p1421_p2 }
  0x32   : > { %p1424_p10 = pnand %p1423_p9, %p1417_p7 }
  0x34   : > { %1427 = shalt.err (!%p1424_p10)
}
  0x35   : > { %s2255_s8 = smov 128   ;;  %s2257_s20 = smov 8  }
  0x36   : > { %1281 = dma.hbm_to_vmem [thread:$0]  (!%p1839_p4), %s1835_s15, 512, %s1844_s18, %s1848_s19, %s2255_s8, %s2255_s8, %s2257_s20  }
  0x37   : > { %s2292_s3 = sld [smem:[#allocation34_spill]]  ;;  %s311_s14 = scalar_lea.vmem [#allocation9], %s1829_s12 }
  0x38   : > { %s318_s6 = sshll.u32 %s311_s14, 4  ;;  %s2293_s1 = sand.u32 1, %s1710_s7   ;;  %s1888_s6 = int_to_ptr.vmem [resolvable:$true] %s318_s6 }
  0x39   : > { %s1892_s28 = scalar_lea.sflag [#allocation10], %s2293_s1 }
  0x3a   : > { %2294 = sst [smem:[#allocation25_spill]] %s1892_s28 }
  0x3d   : > { %s1885_s10 = scalar_lea.hbm %s2292_s3, %s1825_s11  ;;  %s1433_s17 = scalar_lea.hbm %s2292_s3, 4096 }
  0x3e   : > { %s1428_s27 = scalar_lea.hbm %s1885_s10, 512  ;;  %p1434_p11 = scmp.lt.u32.totalorder %s1885_s10, %s2292_s3 }
  0x3f   : > { %p1429_p0 = scmp.ne.s32.totalorder %s1885_s10, %s1428_s27  ;;  %p1435_p12 = scmp.lt.u32.totalorder %s1433_s17, %s1428_s27 }
  0x40   : > { %p1437_p1 = scmp.lt.u32.totalorder %s1428_s27, %s1885_s10 }
  0x41   : > { %p1431_p2 = pnand %p1429_p0, %p1854_p6  ;;  %p1436_p13 = por %p1435_p12, %p1434_p11 }
  0x43   : > { %p1432_p8 = pneg %p1431_p2  ;;  %p1438_p3 = por %p1437_p1, %p1436_p13 }
  0x45   : > { %p1439_p5 = pnand %p1438_p3, %p1432_p8 }
  0x47   : > { %1442 = shalt.err (!%p1439_p5)
}
  0x48   : > { %s1443_s1 = scalar_lea.vmem %s1888_s6, 512  ;;  %s1715_s14 = smov [#allocation9]  }
  0x49   : > { %p1444_p7 = scmp.ne.s32.totalorder %s1888_s6, %s1443_s1  ;;  %s1448_s15 = sshll.u32 %s1715_s14, 4  ;;  %s1449_s15 = int_to_ptr.vmem [resolvable:$false] %s1448_s15 }
  0x4a   : > { %s1450_s8 = scalar_lea.vmem %s1449_s15, 1024  ;;  %p1451_p0 = scmp.lt.s32.totalorder %s1888_s6, %s1449_s15 }
  0x4b   : > { %p1446_p9 = pnand %p1444_p7, %p1854_p6  ;;  %p1452_p2 = scmp.lt.s32.totalorder %s1450_s8, %s1443_s1 }
  0x4d   : > { %p1447_p10 = pneg %p1446_p9  ;;  %p1453_p11 = por %p1452_p2, %p1451_p0 }
  0x4f   : > { %p1454_p12 = pnand %p1453_p11, %p1447_p10 }
  0x51   : > { %1457 = shalt.err (!%p1454_p12)
}
  0x52   : > { %s2295_s27 = smov 128   ;;  %s1920_s18 = sadd.s32 4294967295, %s1710_s7  }
  0x53   : > { %1287 = dma.hbm_to_vmem [thread:$0]  (!%p1839_p4), %s1885_s10, 512, %s1888_s6, %s1892_s28, %s2295_s27, %s2295_s27, %s2257_s20  }
  0x54   : > { %s1125_s17 = sadd.s32 4294967294, %s1710_s7   ;;  %p61_p8 = scmp.ne.s32.totalorder %s1686_s25, %s1682_s24 }
  0x55   : > { %p2266_p13 = scmp.eq.s32.totalorder %s1920_s18, 0  ;;  %p87_p1 = scmp.ne.s32.totalorder %s1674_s22, %s1670_s21 }
  0x56   : > { %p216_p7 = scmp.eq.s32.totalorder %s1125_s17, 15  ;;  %p1126_p10 = scmp.ge.s32.totalorder %s1710_s7, 1 }
  0x57   : > { %p1931_p5 = por %p2266_p13, %p61_p8  ;;  %p1937_p9 = por %p87_p1, %p2266_p13 }
  0x58   : > { %p1942_p0 = por %p216_p7, %p61_p8  ;;  %p223_p2 = scmp.lt.s32.totalorder %s1710_s7, 17 }
  0x59   : > { %s2296_s9 = scalar_select %p1931_p5, 1, 0 }
  0x5a   : > { %s2298_s10 = scalar_select %p1937_p9, 1, 0 }
  0x5b   : > { %2297 = sst [smem:[#allocation26_spill]] %s2296_s9  ;;  %p1947_p11 = pnand %p1126_p10, %p223_p2 }
  0x5c   : > { %2299 = sst [smem:[#allocation27_spill]] %s2298_s10  ;;  %s1716_s1 = smov [#allocation12]  }
  0x5d   : > { %s2300_s6 = scalar_select %p1942_p0, 1, 0 }
  0x5e   : > { %s2302_s21 = scalar_select %p1947_p11, 1, 0 }
  0x5f   : > { %2301 = sst [smem:[#allocation28_spill]] %s2300_s6  ;;  %s236_s14 = sshll.u32 %s1716_s1, 4  ;;  %s237_s14 = int_to_ptr.vmem [resolvable:$true] %s236_s14 }
  0x60   : > { %2303 = sst [smem:[#allocation29_spill]] %s2302_s21  ;;  %p1271_p12 = pneg %p1947_p11 }
  0x61   : > { %s38_s8 = sadd.s32 1, %s1702_s29  ;;  %s41_s20 = sadd.s32 1, %s1706_s30 }
  0x62   : > { %p1955_p1 = pnand %p1271_p12, %p2266_p13  ;;  %p1960_p8 = scmp.ge.s32.totalorder %s38_s8, 8 }
  0x63   : > { %s48_s3 = sadd.s32 1, %s1690_s26  ;;  %s2306_s5 = sld [smem:[#allocation35_spill]] }
  0x64   : > { %s2305_s17 = scalar_select %p1960_p8, 1, 0 }
  0x65   : > { %p1460_p10 = pneg %p1955_p1 }
  0x69   : > { %s1458_s1 = scalar_lea.hbm %s2306_s5, 16 }
  0x6a   : > { %p1459_p7 = scmp.ne.s32.totalorder %s2306_s5, %s1458_s1  ;;  %p1465_p13 = scmp.lt.u32.totalorder %s1458_s1, %s2306_s5 }
  0x6c   : > { %p1461_p2 = pnand %p1460_p10, %p1459_p7 }
  0x6e   : > { %p1462_p12 = pneg %p1461_p2 }
  0x70   : > { %p1467_p3 = pnand %p1465_p13, %p1462_p12 }
  0x72   : > { %1470 = shalt.err (!%p1467_p3)
}
  0x73   : > { %s1471_s28 = scalar_lea.vmem %s237_s14, 16  ;;  %s1478_s24 = scalar_lea.vmem %s237_s14, 32 }
  0x74   : > { %p1472_p0 = scmp.ne.s32.totalorder %s237_s14, %s1471_s28  ;;  %p1479_p11 = scmp.lt.s32.totalorder %s237_s14, %s237_s14 }
  0x75   : > { %p1480_p4 = scmp.lt.s32.totalorder %s1478_s24, %s1471_s28 }
  0x76   : > { %p1474_p9 = pnand %p1472_p0, %p1460_p10 }
  0x77   : > { %p1481_p6 = por %p1480_p4, %p1479_p11 }
  0x78   : > { %p1475_p5 = pneg %p1474_p9 }
  0x7a   : > { %p1482_p8 = pnand %p1481_p6, %p1475_p5 }
  0x7c   : > { %1485 = shalt.err (!%p1482_p8)
}
  0x7d   : > { %1274 = dma.hbm_to_vmem [thread:$0]  (!%p1955_p1), %s2306_s5, 16, %s237_s14, [#allocation13]  }
  0x7e   : > { %p2307_p4 = scmp.ne.s32.totalorder %s2305_s17, 0  ;;  %p55_p6 = scmp.ne.s32.totalorder %s1690_s26, %s1686_s25 }
  0x7f   : > { %p2309_p5 = scmp.eq.s32.totalorder %s1710_s7, 0  ;;  %p2311_p0 = scmp.eq.s32.totalorder %s1920_s18, 15 }
  0x80   : > { %s2354_s8 = smov (%p2307_p4, %s38_s8), 0  ;;  %s2356_s20 = smov (!%p2307_p4, %s41_s20), %s1706_s30 }
  0x81   : > { %2308 = sst [smem:[#allocation30_spill]] %s2354_s8  ;;  %s71_s28 = ssub.s32 %s1702_s29, %s2354_s8 }
  0x82   : > { %p43_p13 = scmp.ge.s32.totalorder %s2356_s20, 2  ;;  %p72_p3 = scmp.eq.s32.totalorder %s71_s28, 0 }
  0x83   : > { %p1995_p9 = por %p2309_p5, %p55_p6  ;;  %p2001_p11 = por %p2311_p0, %p55_p6 }
  0x84   : > { %s2358_s20 = smov (%p43_p13, %s2356_s20), 0  ;;  %s2314_s21 = sadd.s32 1, %s1678_s23 }
  0x85   : > { %s2312_s6 = scalar_select %p2001_p11, 1, 0 }
  0x86   : > { %2313 = sst [smem:[#allocation31_spill]] %s2358_s20  ;;  %s45_s15 = ssub.s32 %s1706_s30, %s2358_s20 }
  0x87   : > { %s2010_s14 = scalar_select %p72_p3, %s1678_s23, %s2314_s21  }
  0x88   : > { %s247_s17 = sand.u32 1, %s1690_s26   ;;  %p46_p1 = scmp.eq.s32.totalorder %s45_s15, 0 }
  0x89   : > { %s1129_s1 = sshll.u32 %s247_s17, 3  ;;  %s1130_s24 = sshll.u32 %s1706_s30, 7 }
  0x8a   : > { %s2019_s22 = scalar_select %p46_p1, %s1690_s26, %s48_s3  }
  0x8b   : > { %s2024_s5 = scalar_lea.hbm %s2243_s0, %s1130_s24  ;;  %s251_s8 = scalar_lea.vmem [#allocation3], %s1129_s1 }
  0x8c   : > { %2315 = sst [smem:[#allocation32_spill]] %s2019_s22  ;;  %s258_s21 = sshll.u32 %s251_s8, 4  ;;  %s2034_s21 = int_to_ptr.vmem [resolvable:$true] %s258_s21 }
  0x8d   : > { %p2316_p8 = scmp.lt.s32.totalorder %s1710_s7, 16  ;;  %s2040_s24 = scalar_lea.hbm %s2245_s2, %s1825_s11 }
  0x8e   : > { %s248_s28 = scalar_lea.sflag [#allocation4], %s247_s17  ;;  %s1486_s20 = scalar_lea.hbm %s2024_s5, 128 }
  0x8f   : > { %p2030_p7 = pnand %p2316_p8, %p1995_p9  ;;  %p1487_p10 = scmp.ne.s32.totalorder %s2024_s5, %s1486_s20 }
  0x90   : > { %s1491_s1 = scalar_lea.hbm %s2243_s0, 256  ;;  %p1492_p6 = scmp.lt.u32.totalorder %s2024_s5, %s2243_s0 }
  0x91   : > { %p1488_p2 = pneg %p2030_p7  ;;  %p1493_p13 = scmp.lt.u32.totalorder %s1491_s1, %s1486_s20 }
  0x92   : > { %p1495_p5 = scmp.lt.u32.totalorder %s1486_s20, %s2024_s5 }
  0x93   : > { %p1489_p12 = pnand %p1488_p2, %p1487_p10  ;;  %p1494_p3 = por %p1493_p13, %p1492_p6 }
  0x95   : > { %p1490_p4 = pneg %p1489_p12  ;;  %p1496_p9 = por %p1495_p5, %p1494_p3 }
  0x97   : > { %p1497_p0 = pnand %p1496_p9, %p1490_p4 }
  0x99   : > { %1500 = shalt.err (!%p1497_p0)
}
  0x9a   : > { %s1501_s11 = scalar_lea.vmem %s2034_s21, 128  ;;  %s1717_s17 = smov [#allocation3]  }
  0x9b   : > { %p1502_p1 = scmp.ne.s32.totalorder %s2034_s21, %s1501_s11  ;;  %s1506_s3 = sshll.u32 %s1717_s17, 4  ;;  %s1507_s3 = int_to_ptr.vmem [resolvable:$false] %s1506_s3 }
  0x9c   : > { %s1508_s30 = scalar_lea.vmem %s1507_s3, 256  ;;  %p1509_p12 = scmp.lt.s32.totalorder %s2034_s21, %s1507_s3 }
  0x9d   : > { %p1504_p8 = pnand %p1502_p1, %p1488_p2  ;;  %p1510_p6 = scmp.lt.s32.totalorder %s1508_s30, %s1501_s11 }
  0x9f   : > { %p1505_p10 = pneg %p1504_p8  ;;  %p1511_p13 = por %p1510_p6, %p1509_p12 }
  0xa1   : > { %p1512_p3 = pnand %p1511_p13, %p1505_p10 }
  0xa3   : > { %1515 = shalt.err (!%p1512_p3)
}
  0xa4   : > { %1278 = dma.hbm_to_vmem [thread:$0]  (!%p2030_p7), %s2024_s5, 128, %s2034_s21, %s248_s28  }
  0xa5   : > { %s290_s20 = scalar_lea.vmem [#allocation8], %s1829_s12  ;;  %s2318_s10 = sand.u32 1, %s1678_s23  }
  0xa6   : > { %s297_s22 = sshll.u32 %s290_s20, 4  ;;  %s2070_s8 = sshll.u32 %s2318_s10, 2  ;;  %s2072_s22 = int_to_ptr.vmem [resolvable:$true] %s297_s22 }
  0xa7   : > { %s1516_s9 = scalar_lea.hbm %s2040_s24, 512  ;;  %p2319_p4 = scmp.ne.s32.totalorder %s2291_s13, 0 }
  0xa8   : > { %p1517_p2 = scmp.ne.s32.totalorder %s2040_s24, %s1516_s9  ;;  %s1521_s11 = scalar_lea.hbm %s2245_s2, 4096 }
  0xa9   : > { %p1522_p7 = scmp.lt.u32.totalorder %s2040_s24, %s2245_s2  ;;  %p1523_p0 = scmp.lt.u32.totalorder %s1521_s11, %s1516_s9 }
  0xaa   : > { %p1519_p5 = pnand %p1517_p2, %p2319_p4  ;;  %p1525_p8 = scmp.lt.u32.totalorder %s1516_s9, %s2040_s24 }
  0xab   : > { %p1524_p1 = por %p1523_p0, %p1522_p7 }
  0xac   : > { %p1520_p9 = pneg %p1519_p5 }
  0xad   : > { %p1526_p10 = por %p1525_p8, %p1524_p1 }
  0xaf   : > { %p1527_p12 = pnand %p1526_p10, %p1520_p9 }
  0xb1   : > { %1530 = shalt.err (!%p1527_p12)
}
  0xb2   : > { %s1531_s5 = scalar_lea.vmem %s2072_s22, 512  ;;  %s1718_s12 = smov [#allocation8]  }
  0xb3   : > { %p1532_p6 = scmp.ne.s32.totalorder %s2072_s22, %s1531_s5  ;;  %s1536_s21 = sshll.u32 %s1718_s12, 4  ;;  %s1537_s21 = int_to_ptr.vmem [resolvable:$false] %s1536_s21 }
  0xb4   : > { %s1538_s28 = scalar_lea.vmem %s1537_s21, 1024  ;;  %p1539_p2 = scmp.lt.s32.totalorder %s2072_s22, %s1537_s21 }
  0xb5   : > { %p1534_p13 = pnand %p1532_p6, %p2319_p4  ;;  %p1540_p5 = scmp.lt.s32.totalorder %s1538_s28, %s1531_s5 }
  0xb7   : > { %p1535_p3 = pneg %p1534_p13  ;;  %p1541_p7 = por %p1540_p5, %p1539_p2 }
  0xb9   : > { %p1542_p0 = pnand %p1541_p7, %p1535_p3 }
  0xbb   : > { %1545 = shalt.err (!%p1542_p0)
}
  0xbc   : > { %p2320_p9 = scmp.ne.s32.totalorder %s2290_s16, 0  ;;  %s2321_s30 = smov 8  }
  0xbd   : > { %s1141_s20 = sshll.u32 %s1702_s29, 6  ;;  %s332_s10 = scalar_lea.vmem [#allocation11], %s2070_s8 }
  0xbe   : > { %1284 = dma.hbm_to_vmem [thread:$0]  (!%p2320_p9), %s2040_s24, 512, %s2072_s22, %s1848_s19, %s2295_s27, %s2295_s27, %s2321_s30  }
  0xbf   : > { %s339_s9 = sshll.u32 %s332_s10, 4  ;;  %s337_s11 = scalar_lea.hbm %s2247_s4, %s1141_s20  ;;  %s340_s9 = int_to_ptr.vmem [resolvable:$true] %s339_s9 }
  0xc0   : > { %s1546_s17 = scalar_lea.hbm %s337_s11, 64  ;;  %s1551_s12 = scalar_lea.hbm %s2247_s4, 512 }
  0xc1   : > { %p1547_p1 = scmp.ne.s32.totalorder %s337_s11, %s1546_s17  ;;  %p1552_p12 = scmp.lt.u32.totalorder %s337_s11, %s2247_s4 }
  0xc2   : > { %p1553_p6 = scmp.lt.u32.totalorder %s1551_s12, %s1546_s17  ;;  %p1555_p3 = scmp.lt.u32.totalorder %s1546_s17, %s337_s11 }
  0xc3   : > { %p1549_p8 = pnand %p1547_p1, %p2319_p4 }
  0xc4   : > { %p1554_p13 = por %p1553_p6, %p1552_p12 }
  0xc5   : > { %p1550_p10 = pneg %p1549_p8 }
  0xc6   : > { %p1556_p2 = por %p1555_p3, %p1554_p13 }
  0xc8   : > { %p1557_p5 = pnand %p1556_p2, %p1550_p10 }
  0xca   : > { %1560 = shalt.err (!%p1557_p5)
}
  0xcb   : > { %s1561_s19 = scalar_lea.vmem %s340_s9, 64  ;;  %s1719_s27 = smov [#allocation11]  }
  0xcc   : > { %p1562_p7 = scmp.ne.s32.totalorder %s340_s9, %s1561_s19  ;;  %s1566_s24 = sshll.u32 %s1719_s27, 4  ;;  %s1567_s24 = int_to_ptr.vmem [resolvable:$false] %s1566_s24 }
  0xcd   : > { %s1568_s22 = scalar_lea.vmem %s1567_s24, 128  ;;  %p1569_p8 = scmp.lt.s32.totalorder %s340_s9, %s1567_s24 }
  0xce   : > { %p1564_p0 = pnand %p1562_p7, %p2319_p4  ;;  %p1570_p11 = scmp.lt.s32.totalorder %s1568_s22, %s1561_s19 }
  0xd0   : > { %p1565_p1 = pneg %p1564_p0  ;;  %p1571_p9 = por %p1570_p11, %p1569_p8 }
  0xd2   : > { %p1572_p6 = pnand %p1571_p9, %p1565_p1 }
  0xd4   : > { %1575 = shalt.err (!%p1572_p6)
}
  0xd5   : > { %p2322_p12 = scmp.ne.s32.totalorder %s2290_s16, 0  ;;  %s2323_s8 = sld [smem:[#allocation25_spill]] }
  0xd6   : > { %s2324_s30 = sld [smem:[#allocation29_spill]] }
  0xdb   : > { %1290 = dma.hbm_to_vmem [thread:$0]  (!%p2322_p12), %s337_s11, 64, %s340_s9, %s2323_s8  }
  0xdc   : > { %p2325_p10 = scmp.ne.s32.totalorder %s2324_s30, 0 }
  0xdd   : > { %s2326_s13 = sld [smem:[#allocation26_spill]] (!%p2325_p10)  ;;  %s2120_s20 = sand.u32 (!%p2325_p10), 1, %s1686_s25  }
  0xde   : > { %348 = sbr.rel (%p2325_p10) target bundleno = 1322 (0x52a), region = 44  ;;  %s1143_s10 = sshll.u32 (!%p2325_p10), %s2120_s20, 3 }
  0xdf   : > { %s351_s15 = scalar_lea.sflag (!%p2325_p10), [#allocation4], %s2120_s20  ;;  %s2124_s1 = scalar_lea.vmem (!%p2325_p10), [#allocation3], %s1143_s10 }
  0xe3   : > { %p2327_p11 = scmp.ne.s32.totalorder (!%p2325_p10), %s2326_s13, 0 }
  0xe5   : > { %1649 = dma.done.wait (%p2327_p11), %s351_s15, 128  }
  0xe6   : > { %1651 = vsyncadd (%p2327_p11), %s351_s15, 4294967168  ;;  %s2328_s16 = sld [smem:[#allocation20_spill]]  ;;  %s2329_s9 = sld [smem:[#allocation27_spill]] }
  0xe7   : > { %s359_s11 = sand.u32 1, %s1920_s18  }
  0xe8   : > { %s360_s5 = scalar_lea.sflag [#allocation7], %s359_s11 }
  0xec   : > { %s361_s17 = sand.u32 1, %s2328_s16   ;;  %p2330_p4 = scmp.ne.s32.totalorder %s2329_s9, 0 }
  0xed   : > { %s1144_s3 = sshll.u32 %s361_s17, 5 }
  0xee   : > { %s2132_s12 = scalar_lea.vmem [#allocation6], %s1144_s3 }
  0xef   : > { %1653 = dma.done.wait (%p2330_p4), %s360_s5, 1024  }
  0xf0   : > { %1655 = vsyncadd (%p2330_p4), %s360_s5, 4294966272  ;;  %s372_s21 = scalar_lea.vmem [#allocation8], %s1144_s3  ;;  %s378_s28 = scalar_lea.sflag [#allocation10], %s359_s11 }
  0xf1   : > { %s2138_s19 = scalar_lea.vmem [#allocation9], %s1144_s3 }
  0xf2   : > { %1657 = dma.done.wait (%p2330_p4), %s378_s28, 576  }
  0xf3   : > { %1659 = vsyncadd (%p2330_p4), %s378_s28, 4294966720  ;;  %s2144_s27 = sshll.u32 %s361_s17, 2  ;;  %p2331_p9 = scmp.eq.s32.totalorder %s1920_s18, 0 }
  0xf4   : > { %s390_s24 = scalar_lea.vmem [#allocation11], %s2144_s27 }
  0xf5   : > { %1661 = dma.done.wait (%p2331_p9), [#allocation13], 16   ;;  %p2332_p13 = pmov %p2331_p9 }
  0xf6   : > { %s2151_s22 = scalar_lea.vmem [#allocation14], %s1143_s10  ;;  %s2333_s8 = sld [smem:[#allocation22_spill]] }
  0xf7   : > { %1663 = vsyncadd (%p2332_p13), [#allocation13], 4294967280 }
  0xfc   : > { %p1150_p3 = scmp.ne.s32.totalorder %s2333_s8, 0 }
  0xfd   : > { %vm447_vm0 = vcmask (!%p1150_p3), 261120   ;;  %v1720_v0 = vmov (!%p1150_p3), 0.0  }
  0xfe   : > { %446 = sbr.rel (%p1150_p3) target bundleno = 261 (0x105), region = 72  ;;  %448 = vst.msk [vmem:[#allocation2] sm:$0xff] (!%p1150_p3), %vm447_vm0, %v1720_v0 }
 0x105 PF: > { %v454_v1 = vld [vmem:[%s372_s21] sm:$0xff]  ;;  %v455_v2 = vld [vmem:[%s372_s21 + $0x8] sm:$0xff]  ;;  %v1721_v4 = vmov 0.0|0.0   ;;  %v456_v7 = vld [vmem:[%s372_s21 + $0x10] sm:$0xff]  ;;  %vm1722_vm1 = vmmov 0   ;;  %v1723_v10 = vmov 0.0  }
 0x106   : > { %v450_v3 = vld [vmem:[%s2132_s12] sm:$0xff]  ;;  %1243 = vmatprep.subr.bf16.mxu1 %v1721_v4  ;;  %v1244_v5 = vpack.c.bf16 %v455_v2, %v454_v1  ;;  %1237 = vmatprep.subr.bf16.mxu0 %v1721_v4  ;;  %v451_v6 = vld [vmem:[%s2132_s12 + $0x8] sm:$0xff]  ;;  %v457_v8 = vld [vmem:[%s372_s21 + $0x18] sm:$0xff]  ;;  %vm463_vm2 = vcmask 261120   ;;  %vm677_vm3 = vcmask 31744   ;;  %vm754_vm4 = vcmask 64512  }
 0x107   : > { %v1238_v9 = vpack.c.bf16 %v451_v6, %v450_v3  ;;  %1208 = vmatprep.mubr.msk.f32.mxu1 %vm1722_vm1, %v1723_v10  ;;  %v452_v11 = vld [vmem:[%s2132_s12 + $0x10] sm:$0xff]  ;;  %v453_v12 = vld [vmem:[%s2132_s12 + $0x18] sm:$0xff]  ;;  %1197 = vmatprep.mubr.msk.f32.mxu0 %vm1722_vm1, %v1723_v10  ;;  %v1247_v13 = vpack.c.bf16 %v457_v8, %v456_v7  ;;  %v458_v16 = vld [vmem:[%s2138_s19] sm:$0xff]  ;;  %vm843_vm5 = vcmask 1043456   ;;  %s2334_s18 = sld [smem:[#allocation22_spill]] }
 0x108   : > { %1245 = vmatpush3.bf16.msra.mxu1 %v1244_v5  ;;  %v1241_v14 = vpack.c.bf16 %v453_v12, %v452_v11  ;;  %v449_v15 = vld [vmem:[%s2124_s1] sm:$0xff]  ;;  %v459_v17 = vld [vmem:[%s2138_s19 + $0x8] sm:$0xff]  ;;  %v462_v36 = vld [vmem:[%s390_s24] sm:$0xf] }
 0x109   : > { %1239 = vmatpush3.bf16.msra.mxu0 %v1238_v9  ;;  %1246 = vmatprep.subr.bf16.mxu1 %v1721_v4  ;;  %v460_v18 = vld [vmem:[%s2138_s19 + $0x10] sm:$0xff]  ;;  %v1250_v19 = vpack.c.bf16 %v459_v17, %v458_v16  ;;  %v461_v20 = vld [vmem:[%s2138_s19 + $0x18] sm:$0xff]  ;;  %v839_v42 = vld [vmem:[#allocation2] sm:$0xff] }
 0x10a   : > { %1240 = vmatprep.subr.bf16.mxu0 %v1721_v4  ;;  %v1253_v21 = vpack.c.bf16 %v461_v20, %v460_v18 }
 0x10c   : > { %1248 = vmatpush3.bf16.msra.mxu1 %v1247_v13 }
 0x10d   : > { %1242 = vmatpush3.bf16.msra.mxu0 %v1241_v14  ;;  %1222 = vmatprep.subr.mxu1 %v1723_v10  ;;  %p1159_p2 = scmp.ne.s32.totalorder %s2334_s18, 7 }
 0x10e   : > { %1249 = vmatprep.subr.bf16.mxu0 %v1721_v4  ;;  %v1160_v47 = vld [vmem:[#allocation12] ss:$0 sm:$0xff] (!%p1159_p2) }
 0x10f   : > { %1209 = vmatmul.mubr.msk.f32.vlgmr.msra.gmra.mrb[0].mxu1 %vm463_vm2, %v449_v15 }
 0x110   : > { %1198 = vmatmul.mubr.msk.f32.vlgmr.msra.gmra.mrb[0].mxu0 %vm463_vm2, %v449_v15  ;;  %1224 = vmatprep.mubr.msk.f32.mxu1 %vm1722_vm1, %v1723_v10 }
 0x111   : > { %1219 = vmatprep.mubr.msk.f32.mxu0 %vm1722_vm1, %v1723_v10  ;;  %1251 = vmatpush3.bf16.msra.mxu0 %v1250_v19 }
 0x112   : > { %1252 = vmatprep.subr.bf16.mxu0 %v1721_v4 }
 0x115   : > { %1254 = vmatpush3.bf16.msra.mxu0 %v1253_v21 }
 0x116   : > { %1232 = vmatprep.subr.mxu0 %v1723_v10 }
 0x118   : > { %1220 = vmatmul.mubr.msk.f32.vlgmr.msra.gmra.mrb[2].mxu0 %vm463_vm2, %v449_v15 }
 0x119   : > { %1234 = vmatprep.mubr.msk.f32.mxu0 %vm1722_vm1, %v1723_v10  ;;  %1233 = vmatpush3.msk.msra.mxu0 %vm843_vm5, %v462_v36 }
 0x1e2   : > { %v603_v22 = vpop.f32.mrb[0].mxu1 }
 0x1e3   : > { %v1210_v23 = vpop.f32.mrb[1].mxu1  ;;  %1223 = vmatpush3.xpose.msk.msra.mxu1 %vm677_vm3, %v603_v22  ;;  %v533_v24 = vpop.f32.mrb[0].mxu0 }
 0x1e4   : > { %v1199_v25 = vpop.f32.mrb[1].mxu0  ;;  %1227 = vmatprep.subr.mxu1 %v1723_v10 }
 0x1e6   : > { %1225 = vmatmul.mubr.msk.f32.vlgmr.msra.gmra.mrb[2].mxu1 %vm677_vm3, %v533_v24 }
 0x1e7   : > { %1229 = vmatprep.mubr.msk.f32.mxu1 %vm1722_vm1, %v1723_v10 }
 0x1eb   : > { %v673_v29 = vpop.f32.mrb[2].mxu0 }
 0x1ec   : > { %v1221_v30 = vpop.f32.mrb[3].mxu0  ;;  %1228 = vmatpush3.msra.mxu1 %v673_v29 }
 0x2b9   : > { %v750_v26 = vpop.f32.mrb[2].mxu1 }
 0x2ba   : > { %v1226_v27 = vpop.f32.mrb[3].mxu1  ;;  %v755_v28 = vsel %vm754_vm4, %v750_v26, -inf }
 0x2bb   : > { %756 = vmax.xlane.f32.xlu0 %v755_v28 }
 0x348   : > { %v757_v31 = vpop.xlane.xlu0 %756 }
 0x349   : > { %v758_v32 = vsub.f32 %v750_v26, %v757_v31 }
 0x34b   : > { %v759_v33 = vmul.f32 1.442695, %v758_v32 }
 0x34d   : > { %1394 = vpow2.f32 %v759_v33 }
 0x357   : > { %v1395_v34 = vpop.eup %1394 }
 0x358   : > { %1230 = vmatmul.mubr.msk.f32.vlgmr.msra.gmra.mrb[4].mxu1 %vm754_vm4, %v1395_v34  ;;  %v761_v35 = vsel %vm754_vm4, %v1395_v34, 0.0 }
 0x359   : > { %762 = vadd.xlane.f32.xlu0 %v761_v35 }
 0x3e6   : > { %v763_v37 = vpop.xlane.xlu0 %762 }
 0x3e7   : > { %1396 = vrcp.f32 %v763_v37 }
 0x3f1   : > { %v1397_v38 = vpop.eup %1396 }
 0x42b   : > { %v833_v39 = vpop.f32.mrb[4].mxu1 }
 0x42c   : > { %v838_v40 = vmul.f32 %v1397_v38, %v833_v39  ;;  %v1231_v41 = vpop.f32.mrb[5].mxu1 }
 0x42e   : > { %1235 = vmatmul.mubr.msk.f32.vlgmr.msra.gmra.mrb[4].mxu0 %vm677_vm3, %v838_v40 }
 0x4fe   : > { %922 = sbr.rel (%p1159_p2) target bundleno = 1295 (0x50f), region = 76 }
 0x501   : > { %v913_v43 = vpop.f32.mrb[4].mxu0 }
 0x502   : > { %v917_v44 = vadd.f32 %v913_v43, %v839_v42  ;;  %v1236_v45 = vpop.f32.mrb[5].mxu0 }
 0x504   : > { %918 = vst.msk [vmem:[#allocation2] sm:$0xff] %vm463_vm2, %v917_v44 }
 0x50b   : > { %v923_v46 = vld [vmem:[#allocation2] sm:$0xff] }
 0x50c   : > { %v931_v48 = vadd.f32 %v1160_v47, %v923_v46 }
 0x50e   : > { %932 = vst.msk [vmem:[%s2151_s22] sm:$0xff] %vm463_vm2, %v931_v48 }
 0x50f PF: > { %s2335_s30 = sld [smem:[#allocation23_spill]]  ;;  %s947_s9 = sshll.u32 %s2151_s22, 4  ;;  %s948_s9 = int_to_ptr.vmem [resolvable:$true] %s947_s9 }
 0x510   : > { %s2336_s1 = sld [smem:[#allocation36_spill]]  ;;  %s934_s11 = scalar_lea.sflag [#allocation5], %s2120_s20 }
 0x511   : > { %s1576_s17 = scalar_lea.vmem %s948_s9, 128  ;;  %p2337_p7 = scmp.ne.s32.totalorder %s2312_s6, 0 }
 0x512   : > { %p1577_p5 = scmp.ne.s32.totalorder %s948_s9, %s1576_s17  ;;  %s1724_s3 = smov [#allocation14]  }
 0x513   : > { %s1580_s5 = sshll.u32 %s1724_s3, 4  ;;  %s1581_s5 = int_to_ptr.vmem [resolvable:$false] %s1580_s5 }
 0x514   : > { %p1578_p0 = pnand %p1577_p5, %p2337_p7  ;;  %s1582_s12 = scalar_lea.vmem %s1581_s5, 256 }
 0x515   : > { %s1162_s13 = sshll.u32 %s2335_s30, 7  ;;  %p1583_p8 = scmp.lt.s32.totalorder %s948_s9, %s1581_s5 }
 0x516   : > { %s2185_s16 = scalar_lea.hbm %s2336_s1, %s1162_s13  ;;  %p1579_p1 = pneg %p1578_p0 }
 0x517   : > { %p1584_p6 = scmp.lt.s32.totalorder %s1582_s12, %s1576_s17 }
 0x519   : > { %p1585_p12 = por %p1584_p6, %p1583_p8 }
 0x51b   : > { %p1586_p10 = pnand %p1585_p12, %p1579_p1 }
 0x51d   : > { %1589 = shalt.err (!%p1586_p10)
}
 0x51e   : > { %s1590_s20 = scalar_lea.hbm %s2185_s16, 128  ;;  %s1594_s19 = scalar_lea.hbm %s2336_s1, 256 }
 0x51f   : > { %p1591_p11 = scmp.ne.s32.totalorder %s2185_s16, %s1590_s20  ;;  %p1595_p13 = scmp.lt.u32.totalorder %s2185_s16, %s2336_s1 }
 0x520   : > { %p1596_p3 = scmp.lt.u32.totalorder %s1594_s19, %s1590_s20  ;;  %p1598_p5 = scmp.lt.u32.totalorder %s1590_s20, %s2185_s16 }
 0x521   : > { %p1592_p4 = pnand %p1591_p11, %p2337_p7 }
 0x522   : > { %p1597_p2 = por %p1596_p3, %p1595_p13 }
 0x523   : > { %p1593_p9 = pneg %p1592_p4 }
 0x524   : > { %p1599_p0 = por %p1598_p5, %p1597_p2 }
 0x526   : > { %p1600_p1 = pnand %p1599_p0, %p1593_p9 }
 0x528   : > { %1603 = shalt.err (!%p1600_p1)
}
 0x529   : > { %1269 = dma.vmem_to_hbm [thread:$0]  (%p2337_p7), %s948_s9, 128, %s2185_s16, %s934_s11  }
 0x52a PF: > { %s2338_s22 = sld [smem:[#allocation21_spill]]  ;;  %s2339_s8 = sld [smem:[#allocation28_spill]] }
 0x52b   : > { %p1298_p8 = scmp.ge.s32.totalorder %s1710_s7, 2 }
 0x530   : > { %s959_s18 = sand.u32 1, %s2338_s22   ;;  %p2340_p6 = scmp.ne.s32.totalorder %s2339_s8, 0 }
 0x531   : > { %s960_s30 = scalar_lea.sflag [#allocation5], %s959_s18 }
 0x532   : > { %p1292_p12 = pnand %p1298_p8, %p2340_p6 }
 0x534   : > { %1665 = dma.done.wait (!%p1292_p12), %s960_s30, 128  }
 0x535   : > { %1667 = vsyncadd (!%p1292_p12), %s960_s30, 4294967168  ;;  %s29_s7 = sadd.s32 1, %s1710_s7   ;;  %s2341_s21 = sld [smem:[#allocation20_spill]] }
 0x536   : > { %p26_p10 = scmp.ge.s32.totalorder %s29_s7, 18   ;;  %s2342_s6 = sld [smem:[#allocation32_spill]] }
 0x537   : > { %s2343_s28 = sld [smem:[#allocation24_spill]]  ;;  %s2344_s13 = sld [smem:[#allocation30_spill]] }
 0x538   : > { %s2345_s30 = sld [smem:[#allocation31_spill]]  ;;  %s2346_s22 = smov %s1678_s23 }
 0x539   : > { %s2347_s23 = smov %s2010_s14  ;;  %s2348_s24 = smov %s1686_s25 }
 0x53a   : > { %s2349_s25 = smov %s1690_s26  ;;  %s2351_s27 = smov %s1702_s29 }
 0x53b   :  { %28 = sbr.rel (!%p26_p10) target bundleno = 19 (0x13), region = 149 }
 0x53c   : > { %s2350_s26 = smov %s2342_s6 }
 0x53d   : > { %s2352_s29 = smov %s2344_s13 }
 0x542   :  { %965 = vsyncpa [#allocation4], 1 }
 0x543   :  { %967 = vsyncpa [#allocation4 + $0x1], 1 }
 0x544   :  { %968 = vsyncpa [#allocation7], 1 }
 0x545   :  { %970 = vsyncpa [#allocation7 + $0x1], 1 }
 0x546   :  { %971 = vsyncpa [#allocation10], 1 }
 0x547   :  { %973 = vsyncpa [#allocation10 + $0x1], 1 }
 0x548   :  { %974 = vsyncpa [#allocation13], 1 }
 0x549   :  { %975 = vsyncpa [#allocation5], 1 }
 0x54a   :  { %977 = vsyncpa [#allocation5 + $0x1], 1 }

</bundles_post_ra>
